<compile_context>
chip_gen: v6e
topology: v6e:2x2x1
jax: 0.10.0
libtpu: 0.0.40
codegen_flags: <defaults>
</compile_context>

<pallas_src>
import jax
import jax.numpy as jnp
import numpy as np
from jax import lax
from jax.experimental import pallas as pl
from jax.experimental.pallas import tpu as pltpu


def _round_up(a, m):
    return (a + m - 1) // m * m


def _make_kernel(cq_pad, compute_dtype, use_mask, approx_recip):
    """Flash-style online-softmax attention over precomputed projections.

    Grid axes: (batch b, output tile mi [parallel], reduction tile ni
    [arbitrary, last]).  Torch semantics:
      s[n, m] = f[:, n] . g[:, m],  beta = softmax_n(s),
      o[:, m] = h @ beta[:, m],     out = gamma * o + x.
    """

    def kernel(*refs):
        if use_mask:
            (fh_ref, g_ref, x_ref, mask_ref, gamma_ref,
             o_ref, m_sc, l_sc, acc_sc) = refs
        else:
            (fh_ref, g_ref, x_ref, gamma_ref,
             o_ref, m_sc, l_sc, acc_sc) = refs
            mask_ref = None

        ni = pl.program_id(2)

        @pl.when(ni == 0)
        def _init():
            m_sc[...] = jnp.full(m_sc.shape, -1e30, m_sc.dtype)
            l_sc[...] = jnp.zeros(l_sc.shape, l_sc.dtype)
            acc_sc[...] = jnp.zeros(acc_sc.shape, acc_sc.dtype)

        # Precomputed (outside the kernel) projections, already in
        # compute_dtype: no per-step casts or bias adds on the MXU operands.
        fh = fh_ref[0]                       # (Cq_pad + C_pad, Tn)
        f = fh[:cq_pad]                      # query proj of reduction tile
        h = fh[cq_pad:]                      # value proj of reduction tile
        g = g_ref[0]                         # (Cq_pad, Tm) key proj of out tile

        # s[n, m] = sum_q f[q, n] g[q, m]: contract channel axis directly.
        s = lax.dot_general(
            f, g, dimension_numbers=(((0,), (0,)), ((), ())),
            preferred_element_type=jnp.float32)            # (Tn, Tm) f32

        if use_mask:
            # Additive 0 / -1e30 column mask (precomputed); single VPU add.
            s = s + mask_ref[...]                          # (Tn, 1) broadcast

        # Online softmax over the reduction axis (axis 0); normalization
        # deferred to the finalize.  Running stats stay in f32.
        m_prev = m_sc[...]
        m_new = jnp.maximum(m_prev, jnp.max(s, axis=0, keepdims=True))  # (1,Tm)
        alpha = jnp.exp(m_prev - m_new)
        # exp in compute_dtype (packed bf16 on v6e/v7x halves EUP pushes);
        # the sum accumulates in f32.
        p = jnp.exp((s - m_new).astype(compute_dtype))                  # (Tn,Tm)
        l_sc[...] = alpha * l_sc[...] + jnp.sum(
            p, axis=0, keepdims=True, dtype=jnp.float32)
        acc_sc[...] = alpha * acc_sc[...] + jnp.dot(
            h, p, preferred_element_type=jnp.float32)                   # (C,Tm)
        m_sc[...] = m_new

        @pl.when(ni == pl.num_programs(2) - 1)
        def _finalize():
            # Normalize only the small (C, Tm) accumulator.  approx=True moves
            # the divide onto the idle EUP slot on the bf16 path; exact kept
            # for f32 to hold the 1e-4 test tolerance.
            inv_l = pl.reciprocal(l_sc[...], approx=approx_recip)       # (1,Tm)
            out = gamma_ref[0] * acc_sc[...] * inv_l + x_ref[0].astype(jnp.float32)
            o_ref[0] = out.astype(o_ref.dtype)

    return kernel


def self_attention_pallas(x, wq, bq, wk, bk, wv, bv, gamma, *,
                          block_m=None, block_n=None,
                          compute_dtype=jnp.bfloat16,
                          vmem_budget_bytes=28 * 1024 * 1024):
    """Pallas TPU forward pass for the PyTorch `_SelfAttention` module."""
    B, C, H, W = x.shape
    N = H * W
    Cq = wq.shape[0]

    compute_dtype = jnp.dtype(compute_dtype)
    is_f32 = compute_dtype == jnp.dtype(jnp.float32)
    sub = 8 if is_f32 else 16                 # sublane granule of compute dtype
    C_pad = _round_up(C, sub)
    Cq_pad = _round_up(Cq, sub)
    Cfh = Cq_pad + C_pad

    # ---- Tile sizing: decoupled Tm (output) / Tn (reduction) -------------
    n128 = _round_up(N, 128)
    if block_m is None:
        block_m = min(1024, n128)             # big Tm amortizes grid overhead
        if B == 1 and n128 >= 256:
            # Feed both v7x TensorCores when there is only one batch element.
            block_m = min(block_m, max(128, _round_up((N + 1) // 2, 128)))
    block_m = max(128, _round_up(block_m, 128))
    if block_n is None:
        block_n = min(512, n128)              # moderate Tn bounds s/e temporaries
    block_n = max(128, _round_up(block_n, 128))

    comp_sz = compute_dtype.itemsize
    x_sz = jnp.dtype(x.dtype).itemsize

    def vmem_est(tm, tn):
        est = 2 * Cfh * tn * comp_sz          # fh tiles (double buffered)
        est += 2 * Cq_pad * tm * comp_sz      # g tiles
        est += 2 * C_pad * tm * x_sz          # residual x tiles
        est += 2 * C_pad * tm * x_sz          # output tiles
        est += 2 * tn * 128 * 4               # padding-mask tile (lane padded)
        est += (2 * tm + C_pad * tm) * 4      # m/l/acc scratch
        est += 2 * tn * tm * 4                # score/exp temporaries
        return est

    # Generation-safe working set (fits v7x's smaller VMEM).
    while vmem_est(block_m, block_n) > vmem_budget_bytes and block_m > 128:
        block_m = max(128, _round_up(block_m // 2, 128))
    while vmem_est(block_m, block_n) > vmem_budget_bytes and block_n > 128:
        block_n = max(128, _round_up(block_n // 2, 128))

    N_pad_m = _round_up(N, block_m)           # output-axis padding
    N_pad_n = _round_up(N, block_n)           # reduction-axis padding
    num_mi = N_pad_m // block_m
    num_ni = N_pad_n // block_n
    use_mask = N_pad_n != N

    # ---- Hoisted 1x1-conv projections (one XLA batched matmul each) ------
    xf = x.reshape(B, C, N)
    f = jnp.einsum('oc,bcn->bon', wq, xf) + bq[None, :, None]   # (B, Cq, N)
    g = jnp.einsum('oc,bcn->bon', wk, xf) + bk[None, :, None]   # (B, Cq, N)
    h = jnp.einsum('oc,bcn->bon', wv, xf) + bv[None, :, None]   # (B, C,  N)

    f_p = jnp.pad(f, ((0, 0), (0, Cq_pad - Cq), (0, N_pad_n - N)))
    h_p = jnp.pad(h, ((0, 0), (0, C_pad - C), (0, N_pad_n - N)))
    fh_p = jnp.concatenate([f_p, h_p], axis=1).astype(compute_dtype)
    g_p = jnp.pad(g, ((0, 0), (0, Cq_pad - Cq),
                      (0, N_pad_m - N))).astype(compute_dtype)
    x_p = jnp.pad(xf, ((0, 0), (0, C_pad - C), (0, N_pad_m - N)))

    gamma_s = gamma.reshape(1).astype(jnp.float32)               # scalar -> SMEM

    in_specs = [
        pl.BlockSpec((1, Cfh, block_n), lambda b, mi, ni: (b, 0, ni)),    # [f;h]
        pl.BlockSpec((1, Cq_pad, block_m), lambda b, mi, ni: (b, 0, mi)), # g
        pl.BlockSpec((1, C_pad, block_m), lambda b, mi, ni: (b, 0, mi)),  # x res
    ]
    operands = [fh_p, g_p, x_p]
    if use_mask:
        col = np.arange(N_pad_n, dtype=np.int32)
        mask = jnp.asarray(
            np.where(col < N, 0.0, -1e30).astype(np.float32)).reshape(N_pad_n, 1)
        in_specs.append(pl.BlockSpec((block_n, 1), lambda b, mi, ni: (ni, 0)))
        operands.append(mask)
    in_specs.append(pl.BlockSpec(memory_space=pltpu.MemorySpace.SMEM))    # gamma
    operands.append(gamma_s)

    kernel = _make_kernel(Cq_pad, compute_dtype, use_mask,
                          approx_recip=not is_f32)

    # Explicit scoped-VMEM limit sized from the actual tile footprint
    # (v5e's default is only 16 MiB); capped to stay safe on v7x (64 MiB).
    vmem_limit = int(min(max(int(vmem_est(block_m, block_n) * 1.5) + (4 << 20),
                             32 << 20), 64 << 20))

    out = pl.pallas_call(
        kernel,
        out_shape=jax.ShapeDtypeStruct((B, C_pad, N_pad_m), x.dtype),
        grid=(B, num_mi, num_ni),
        in_specs=in_specs,
        out_specs=pl.BlockSpec((1, C_pad, block_m), lambda b, mi, ni: (b, 0, mi)),
        scratch_shapes=[
            pltpu.VMEM((1, block_m), jnp.float32),       # running max
            pltpu.VMEM((1, block_m), jnp.float32),       # running sum
            pltpu.VMEM((C_pad, block_m), jnp.float32),   # unnormalized output acc
        ],
        compiler_params=pltpu.CompilerParams(
            dimension_semantics=("parallel", "parallel", "arbitrary"),
            vmem_limit_bytes=vmem_limit),
    )(*operands)

    return out[:, :C, :N].reshape(B, C, H, W)


def self_attention_reference(x, wq, bq, wk, bk, wv, bv, gamma):
    """Pure-JAX reference matching the PyTorch forward exactly."""
    B, C, H, W = x.shape
    N = H * W
    xf = x.reshape(B, C, N)
    f = jnp.einsum('oc,bcn->bon', wq, xf) + bq[None, :, None]
    g = jnp.einsum('oc,bcn->bon', wk, xf) + bk[None, :, None]
    h = jnp.einsum('oc,bcn->bon', wv, xf) + bv[None, :, None]
    s = jnp.einsum('bqn,bqm->bnm', f, g)          # f.transpose(1,2) @ g : (B,N,N)
    beta = jax.nn.softmax(s, axis=1)              # softmax over dim=1 as in torch
    o = gamma[0] * jnp.einsum('bcn,bnm->bcm', h, beta) + xf
    return o.reshape(B, C, H, W)


if __name__ == "__main__":
    key = jax.random.PRNGKey(0)

    def make_params(key, B, C, H, W, gamma_val):
        Cq = max(C // 8, 1)
        ks = jax.random.split(key, 7)
        x = jax.random.normal(ks[0], (B, C, H, W), dtype=jnp.float32)
        wq = 0.1 * jax.random.normal(ks[1], (Cq, C), dtype=jnp.float32)
        bq = 0.1 * jax.random.normal(ks[2], (Cq,), dtype=jnp.float32)
        wk = 0.1 * jax.random.normal(ks[3], (Cq, C), dtype=jnp.float32)
        bk = 0.1 * jax.random.normal(ks[4], (Cq,), dtype=jnp.float32)
        wv = 0.1 * jax.random.normal(ks[5], (C, C), dtype=jnp.float32)
        bv = 0.1 * jax.random.normal(ks[6], (C,), dtype=jnp.float32)
        # Module inits gamma to 0.0 (output == x); use nonzero so the attention
        # path is exercised numerically.
        gamma = jnp.array([gamma_val], dtype=jnp.float32)
        return x, wq, bq, wk, bk, wv, bv, gamma

    k1, k2 = jax.random.split(key)

    # Case 1: module-consistent small shape (B=2, C=16 -> C//8=2, H=W=8);
    # exercises the reduction-axis padding-mask path (N=64 -> 128), f32 path.
    args1 = make_params(k1, 2, 16, 8, 8, 0.5)
    out1 = jax.block_until_ready(
        self_attention_pallas(*args1, compute_dtype=jnp.float32))
    ref1 = self_attention_reference(*args1)
    np.testing.assert_allclose(np.asarray(out1), np.asarray(ref1),
                               rtol=1e-4, atol=1e-4)

    # Case 2: multi-tile online-softmax path, no padding mask
    # (N=256 with 128x128 tiles -> grid (1, 2, 2)), f32 path.
    args2 = make_params(k2, 1, 8, 16, 16, 0.7)
    out2 = jax.block_until_ready(
        self_attention_pallas(*args2, block_m=128, block_n=128,
                              compute_dtype=jnp.float32))
    ref2 = self_attention_reference(*args2)
    np.testing.assert_allclose(np.asarray(out2), np.asarray(ref2),
                               rtol=1e-4, atol=1e-4)

    # Case 3: default bf16 MXU path (v6e/v7x fast path) with f32 accumulation.
    out3 = jax.block_until_ready(self_attention_pallas(*args1))
    np.testing.assert_allclose(np.asarray(out3), np.asarray(ref1),
                               rtol=5e-2, atol=5e-2)

    print("KERNEL_OK")
</pallas_src>

<mosaic_0001>
module attributes {stable_mosaic.version = 11 : i64} {
  func.func @kernel(%arg0: i32, %arg1: i32, %arg2: i32, %arg3: memref<1x24x128xf32, #tpu.memory_space<vmem>>, %arg4: memref<1x8x128xf32, #tpu.memory_space<vmem>>, %arg5: memref<1x16x128xf32, #tpu.memory_space<vmem>>, %arg6: memref<128x1xf32, #tpu.memory_space<vmem>>, %arg7: memref<1xf32, #tpu.memory_space<smem>>, %arg8: memref<1x16x128xf32, #tpu.memory_space<vmem>>, %arg9: memref<1x128xf32, #tpu.memory_space<vmem>>, %arg10: memref<1x128xf32, #tpu.memory_space<vmem>>, %arg11: memref<16x128xf32, #tpu.memory_space<vmem>>) attributes {dimension_semantics = [#tpu.dimension_semantics<parallel>, #tpu.dimension_semantics<parallel>, #tpu.dimension_semantics<arbitrary>], iteration_bounds = array<i64: 2, 1, 1>, scalar_prefetch = 0 : i64, scratch_operands = 3 : i64, tpu.core_type = #tpu.core_type<tc>, window_params = [{transform_indices = @transform_0, window_bounds = array<i64: 1, 24, 128>}, {transform_indices = @transform_1, window_bounds = array<i64: 1, 8, 128>}, {transform_indices = @transform_2, window_bounds = array<i64: 1, 16, 128>}, {transform_indices = @transform_3, window_bounds = array<i64: 128, 1>}, {transform_indices = @transform_4, window_bounds = array<i64: 1>}, {transform_indices = @transform_5, window_bounds = array<i64: 1, 16, 128>}]} {
    %c0_i32 = arith.constant 0 : i32
    %0 = arith.cmpi eq, %arg2, %c0_i32 : i32
    %1 = arith.extui %0 : i1 to i32
    %c0_i32_0 = arith.constant 0 : i32
    %2 = arith.cmpi ne, %1, %c0_i32_0 : i32
    scf.if %2 {
      %cst_25 = arith.constant -1.000000e+30 : f32
      %38 = vector.broadcast %cst_25 : f32 to vector<1x128xf32>
      %c0_26 = arith.constant 0 : index
      %c0_27 = arith.constant 0 : index
      %39 = vector.load %arg9[%c0_26, %c0_27] : memref<1x128xf32, #tpu.memory_space<vmem>>, vector<1x128xf32>
      tpu.vector_store %arg9[%c0_26, %c0_27], %38 {strides = array<i32>} : memref<1x128xf32, #tpu.memory_space<vmem>>, vector<1x128xf32>,
      %cst_28 = arith.constant 0.000000e+00 : f32
      %40 = vector.broadcast %cst_28 : f32 to vector<1x128xf32>
      %c0_29 = arith.constant 0 : index
      %c0_30 = arith.constant 0 : index
      %41 = vector.load %arg10[%c0_29, %c0_30] : memref<1x128xf32, #tpu.memory_space<vmem>>, vector<1x128xf32>
      tpu.vector_store %arg10[%c0_29, %c0_30], %40 {strides = array<i32>} : memref<1x128xf32, #tpu.memory_space<vmem>>, vector<1x128xf32>,
      %cst_31 = arith.constant 0.000000e+00 : f32
      %42 = vector.broadcast %cst_31 : f32 to vector<16x128xf32>
      %c0_32 = arith.constant 0 : index
      %c0_33 = arith.constant 0 : index
      %43 = vector.load %arg11[%c0_32, %c0_33] : memref<16x128xf32, #tpu.memory_space<vmem>>, vector<16x128xf32>
      tpu.vector_store %arg11[%c0_32, %c0_33], %42 {strides = array<i32>} : memref<16x128xf32, #tpu.memory_space<vmem>>, vector<16x128xf32>,
    } else {
    }
    %c0 = arith.constant 0 : index
    %c0_1 = arith.constant 0 : index
    %c0_2 = arith.constant 0 : index
    %3 = vector.load %arg3[%c0, %c0_1, %c0_2] : memref<1x24x128xf32, #tpu.memory_space<vmem>>, vector<1x24x128xf32>
    %4 = vector.shape_cast %3 : vector<1x24x128xf32> to vector<24x128xf32>
    %5 = vector.extract_strided_slice %4 {offsets = [0, 0], sizes = [8, 128], strides = [1, 1]} : vector<24x128xf32> to vector<8x128xf32>
    %6 = vector.extract_strided_slice %4 {offsets = [8, 0], sizes = [16, 128], strides = [1, 1]} : vector<24x128xf32> to vector<16x128xf32>
    %c0_3 = arith.constant 0 : index
    %c0_4 = arith.constant 0 : index
    %c0_5 = arith.constant 0 : index
    %7 = vector.load %arg4[%c0_3, %c0_4, %c0_5] : memref<1x8x128xf32, #tpu.memory_space<vmem>>, vector<1x8x128xf32>
    %8 = vector.shape_cast %7 : vector<1x8x128xf32> to vector<8x128xf32>
    %cst = arith.constant dense<0.000000e+00> : vector<128x128xf32>
    %9 = tpu.matmul %5, %8, %cst {dimension_numbers = #tpu.dot_dimension_numbers<[0], [0], [1], [1], [0, 1, 1, 1], [], []>} : vector<8x128xf32>, vector<8x128xf32>, vector<128x128xf32> -> vector<128x128xf32>
    %c0_6 = arith.constant 0 : index
    %c0_7 = arith.constant 0 : index
    %10 = vector.load %arg6[%c0_6, %c0_7] : memref<128x1xf32, #tpu.memory_space<vmem>>, vector<128x1xf32>
    %11 = vector.broadcast %10 : vector<128x1xf32> to vector<128x128xf32>
    %12 = arith.addf %9, %11 : vector<128x128xf32>
    %c0_8 = arith.constant 0 : index
    %c0_9 = arith.constant 0 : index
    %13 = vector.load %arg9[%c0_8, %c0_9] : memref<1x128xf32, #tpu.memory_space<vmem>>, vector<1x128xf32>
    %cst_10 = arith.constant dense<0xFF800000> : vector<128xf32>
    %14 = vector.multi_reduction <maximumf>, %12, %cst_10 [0] : vector<128x128xf32> to vector<128xf32>
    %15 = vector.shape_cast %14 : vector<128xf32> to vector<1x128xf32>
    %16 = arith.maximumf %13, %15 : vector<1x128xf32>
    %17 = arith.subf %13, %16 : vector<1x128xf32>
    %18 = math.exp %17 : vector<1x128xf32>
    %19 = vector.broadcast %16 : vector<1x128xf32> to vector<128x128xf32>
    %20 = arith.subf %12, %19 : vector<128x128xf32>
    %21 = math.exp %20 : vector<128x128xf32>
    %c0_11 = arith.constant 0 : index
    %c0_12 = arith.constant 0 : index
    %22 = vector.load %arg10[%c0_11, %c0_12] : memref<1x128xf32, #tpu.memory_space<vmem>>, vector<1x128xf32>
    %23 = arith.mulf %18, %22 : vector<1x128xf32>
    %cst_13 = arith.constant dense<0.000000e+00> : vector<128xf32>
    %24 = vector.multi_reduction <add>, %21, %cst_13 [0] : vector<128x128xf32> to vector<128xf32>
    %25 = vector.shape_cast %24 : vector<128xf32> to vector<1x128xf32>
    %26 = arith.addf %23, %25 : vector<1x128xf32>
    %c0_14 = arith.constant 0 : index
    %c0_15 = arith.constant 0 : index
    %27 = vector.load %arg10[%c0_14, %c0_15] : memref<1x128xf32, #tpu.memory_space<vmem>>, vector<1x128xf32>
    tpu.vector_store %arg10[%c0_14, %c0_15], %26 {strides = array<i32>} : memref<1x128xf32, #tpu.memory_space<vmem>>, vector<1x128xf32>,
    %c0_16 = arith.constant 0 : index
    %c0_17 = arith.constant 0 : index
    %28 = vector.load %arg11[%c0_16, %c0_17] : memref<16x128xf32, #tpu.memory_space<vmem>>, vector<16x128xf32>
    %29 = vector.broadcast %18 : vector<1x128xf32> to vector<16x128xf32>
    %30 = arith.mulf %29, %28 : vector<16x128xf32>
    %cst_18 = arith.constant dense<0.000000e+00> : vector<16x128xf32>
    %31 = tpu.matmul %6, %21, %cst_18 {dimension_numbers = #tpu.dot_dimension_numbers<[1], [0], [0], [1], [0, 0, 1, 1], [], []>} : vector<16x128xf32>, vector<128x128xf32>, vector<16x128xf32> -> vector<16x128xf32>
    %32 = arith.addf %30, %31 : vector<16x128xf32>
    %c0_19 = arith.constant 0 : index
    %c0_20 = arith.constant 0 : index
    %33 = vector.load %arg11[%c0_19, %c0_20] : memref<16x128xf32, #tpu.memory_space<vmem>>, vector<16x128xf32>
    tpu.vector_store %arg11[%c0_19, %c0_20], %32 {strides = array<i32>} : memref<16x128xf32, #tpu.memory_space<vmem>>, vector<16x128xf32>,
    %c0_21 = arith.constant 0 : index
    %c0_22 = arith.constant 0 : index
    %34 = vector.load %arg9[%c0_21, %c0_22] : memref<1x128xf32, #tpu.memory_space<vmem>>, vector<1x128xf32>
    tpu.vector_store %arg9[%c0_21, %c0_22], %16 {strides = array<i32>} : memref<1x128xf32, #tpu.memory_space<vmem>>, vector<1x128xf32>,
    %c0_i32_23 = arith.constant 0 : i32
    %35 = arith.cmpi eq, %arg2, %c0_i32_23 : i32
    %36 = arith.extui %35 : i1 to i32
    %c0_i32_24 = arith.constant 0 : i32
    %37 = arith.cmpi ne, %36, %c0_i32_24 : i32
    scf.if %37 {
      %c0_25 = arith.constant 0 : index
      %c0_26 = arith.constant 0 : index
      %38 = vector.load %arg10[%c0_25, %c0_26] : memref<1x128xf32, #tpu.memory_space<vmem>>, vector<1x128xf32>
      %39 = tpu.reciprocal %38 : vector<1x128xf32> -> vector<1x128xf32>
      %c0_27 = arith.constant 0 : index
      %40 = memref.load %arg7[%c0_27] : memref<1xf32, #tpu.memory_space<smem>>
      %c0_28 = arith.constant 0 : index
      %c0_29 = arith.constant 0 : index
      %41 = vector.load %arg11[%c0_28, %c0_29] : memref<16x128xf32, #tpu.memory_space<vmem>>, vector<16x128xf32>
      %42 = vector.broadcast %40 : f32 to vector<16x128xf32>
      %43 = arith.mulf %42, %41 : vector<16x128xf32>
      %44 = vector.broadcast %39 : vector<1x128xf32> to vector<16x128xf32>
      %45 = arith.mulf %43, %44 : vector<16x128xf32>
      %c0_30 = arith.constant 0 : index
      %c0_31 = arith.constant 0 : index
      %c0_32 = arith.constant 0 : index
      %46 = vector.load %arg5[%c0_30, %c0_31, %c0_32] : memref<1x16x128xf32, #tpu.memory_space<vmem>>, vector<1x16x128xf32>
      %47 = vector.shape_cast %46 : vector<1x16x128xf32> to vector<16x128xf32>
      %48 = arith.addf %45, %47 : vector<16x128xf32>
      %c0_33 = arith.constant 0 : index
      %c0_34 = arith.constant 0 : index
      %c0_35 = arith.constant 0 : index
      %49 = vector.load %arg8[%c0_33, %c0_34, %c0_35] : memref<1x16x128xf32, #tpu.memory_space<vmem>>, vector<1x16x128xf32>
      %50 = vector.shape_cast %49 : vector<1x16x128xf32> to vector<16x128xf32>
      %51 = vector.shape_cast %48 : vector<16x128xf32> to vector<1x16x128xf32>
      tpu.vector_store %arg8[%c0_33, %c0_34, %c0_35], %51 {strides = array<i32>} : memref<1x16x128xf32, #tpu.memory_space<vmem>>, vector<1x16x128xf32>,
    } else {
    }
    return
  }
  func.func @transform_0(%arg0: i32, %arg1: i32, %arg2: i32) -> (i32, i32, i32) {
    %c0_i32 = arith.constant 0 : i32
    %c0_i32_0 = arith.constant 0 : i32
    return %arg0, %c0_i32, %arg2 : i32, i32, i32
  }
  func.func @transform_1(%arg0: i32, %arg1: i32, %arg2: i32) -> (i32, i32, i32) {
    %c0_i32 = arith.constant 0 : i32
    %c0_i32_0 = arith.constant 0 : i32
    return %arg0, %c0_i32, %arg1 : i32, i32, i32
  }
  func.func @transform_2(%arg0: i32, %arg1: i32, %arg2: i32) -> (i32, i32, i32) {
    %c0_i32 = arith.constant 0 : i32
    %c0_i32_0 = arith.constant 0 : i32
    return %arg0, %c0_i32, %arg1 : i32, i32, i32
  }
  func.func @transform_3(%arg0: i32, %arg1: i32, %arg2: i32) -> (i32, i32) {
    %c0_i32 = arith.constant 0 : i32
    %c0_i32_0 = arith.constant 0 : i32
    return %arg2, %c0_i32 : i32, i32
  }
  func.func @transform_4(%arg0: i32, %arg1: i32, %arg2: i32) -> i32 {
    %c0_i32 = arith.constant 0 : i32
    %c0_i32_0 = arith.constant 0 : i32
    return %c0_i32 : i32
  }
  func.func @transform_5(%arg0: i32, %arg1: i32, %arg2: i32) -> (i32, i32, i32) {
    %c0_i32 = arith.constant 0 : i32
    %c0_i32_0 = arith.constant 0 : i32
    return %arg0, %c0_i32, %arg1 : i32, i32, i32
  }
}

</mosaic_0001>

<bundles_post_ra>
// kernel: tpu_custom_call.1
= control target key start
LH: loop header
LB: loop body
LE: loop exit
PB: predicated region body
PF: predicated region fallthrough
CT: control target
= control target key end

     0   :  { %s1640_s0 = inlined_call_operand.vmem [shape: f32[2,24,128], index: 0, kind: input, shape index: {}]   ;;  %s1641_s1 = inlined_call_operand.vmem [shape: f32[2,8,128], index: 1, kind: input, shape index: {}]   ;;  %s1642_s2 = inlined_call_operand.vmem [shape: f32[2,16,128], index: 2, kind: input, shape index: {}]   ;;  %s1643_s3 = inlined_call_operand.vmem [shape: f32[128,1], index: 3, kind: input, shape index: {}]   ;;  %s1644_s4 = inlined_call_operand.<no memory space> [shape: f32[1], index: 4, kind: input, shape index: {}]   ;;  %s1645_s5 = inlined_call_operand.hbm [shape: f32[2,16,128], index: 5, kind: output, shape index: {}]  }
   0x1   :  { %10 = sst [smem:[#allocation5]] %s1644_s4 }
   0x2   :  { %11 = vsyncpa [#allocation7], 0 }
   0x3   :  { %13 = vsyncpa [#allocation7 + $0x1], 0  ;;  %s1381_s20 = smov 0   ;;  %s1383_s21 = smov 0  }
   0x4   :  { %s1385_s22 = smov 0   ;;  %s1387_s23 = smov 0  }
   0x5   :  { %s1389_s24 = smov 0   ;;  %s1391_s25 = smov 0  }
   0x6 LB: > { %s1035_s4 = sadd.s32 4294967295, %s1340_s25   ;;  %s1036_s26 = sadd.s32 4294967294, %s1340_s25   ;;  %s1340_s25 = sphi %s1391_s25, %s19_s25   ;;  %s1336_s24 = sphi %s1389_s24, %s1652_s24   ;;  %s1332_s23 = sphi %s1387_s23, %s1651_s23   ;;  %s1328_s22 = sphi %s1385_s22, %s1650_s22   ;;  %s1324_s21 = sphi %s1383_s21, %s1649_s21   ;;  %s1320_s20 = sphi %s1381_s20, %s1648_s20  }
   0x7   : > { %s38_s27 = sadd.s32 1, %s1336_s24  ;;  %s178_s28 = sadd.s32 1, %s1328_s22 }
   0x8   : > { %p40_p0 = scmp.ge.s32.totalorder %s38_s27, 2  ;;  %p188_p1 = scmp.ne.s32.totalorder %s1328_s22, %s1324_s21 }
   0x9   : > { %p189_p2 = scmp.eq.s32.totalorder %s1035_s4, 1  ;;  %p194_p3 = scmp.ne.s32.totalorder %s1324_s21, %s1320_s20 }
   0xa   : > { %s1654_s27 = smov (%p40_p0, %s38_s27), 0  ;;  %p195_p5 = scmp.eq.s32.totalorder %s1036_s26, 1 }
   0xb   : > { %p1421_p4 = por %p189_p2, %p188_p1  ;;  %s173_s30 = ssub.s32 %s1336_s24, %s1654_s27 }
   0xc   : > { %p1040_p6 = scmp.ge.s32.totalorder %s1340_s25, 1  ;;  %p176_p7 = scmp.eq.s32.totalorder %s173_s30, 0 }
   0xd   : > { %p1428_p8 = por %p195_p5, %p194_p3  ;;  %p257_p9 = scmp.lt.s32.totalorder %s1340_s25, 3 }
   0xe   : > { %s1434_s7 = scalar_select %p176_p7, %s1328_s22, %s178_s28  }
   0xf   : > { %p258_p10 = pnand %p1040_p6, %p257_p9 }
  0x10   : > { %p308_p11 = scmp.lt.s32.totalorder (!%p258_p10), %s1332_s23, 1  ;;  %s305_s26 = sand.u32 (!%p258_p10), 1, %s1324_s21  }
  0x11   : > { %261 = sbr.rel (%p258_p10) target bundleno = 699 (0x2bb), region = 40  ;;  %s1041_s30 = sshll.u32 (!%p258_p10), %s305_s26, 4 }
  0x12   : > { %s307_s12 = scalar_lea.vmem (!%p258_p10), [#allocation6], %s1041_s30  ;;  %s1595_s18 = scalar_lea.sflag (!%p258_p10), [#allocation7], %s305_s26 }
  0x13   : > { %s1345_s19 = smov (!%p258_p10), [#allocation6]  }
  0x14   : > { %s1268_s4 = sshll.u32 (!%p258_p10), %s1345_s19, 4  ;;  %s1269_s4 = int_to_ptr.vmem [resolvable:$false] %s1268_s4 }
  0x16   : > { %s1438_s8 = scalar_select %p308_p11, %s1332_s23, 1  ;;  %v350_v2 = vld [vmem:[%s1643_s3 + $0x8] sm:$0xff]  ;;  %v1342_v3 = vmov 0   ;;  %v351_v4 = vld [vmem:[%s1643_s3 + $0x10] sm:$0xff]  ;;  %v352_v5 = vld [vmem:[%s1643_s3 + $0x18] sm:$0xff]  ;;  %vm477_vm0 = vcmask 64512  }
  0x17   : > { %1227 = vset.pattern.permute.xlu1 %v1342_v3  ;;  %v353_v6 = vld [vmem:[%s1643_s3 + $0x20] sm:$0xff]  ;;  %v354_v7 = vld [vmem:[%s1643_s3 + $0x28] sm:$0xff]  ;;  %v355_v8 = vld [vmem:[%s1643_s3 + $0x30] sm:$0xff]  ;;  %v1343_v35 = vmov -1e+30   ;;  %v1344_v38 = vmov 0.0  }
  0x18   : > { %s1165_s9 = smul.u32 24, %s1438_s8  ;;  %s1043_s10 = sshll.u32 %s1438_s8, 3  ;;  %372 = vperm.xlu1 %1227, %v350_v2   ;;  %v356_v9 = vld [vmem:[%s1643_s3 + $0x38] sm:$0xff]  ;;  %v357_v10 = vld [vmem:[%s1643_s3 + $0x40] sm:$0xff]  ;;  %v358_v11 = vld [vmem:[%s1643_s3 + $0x48] sm:$0xff] }
  0x19   : > { %s322_s13 = scalar_lea.vmem %s1641_s1, %s1043_s10  ;;  %v359_v12 = vld [vmem:[%s1643_s3 + $0x50] sm:$0xff]  ;;  %v360_v13 = vld [vmem:[%s1643_s3 + $0x58] sm:$0xff]  ;;  %v361_v14 = vld [vmem:[%s1643_s3 + $0x60] sm:$0xff]  ;;  %341 = vst [vmem:[#allocation2] sm:$0x1] %v1343_v35  ;;  %s1067_s28 = sshll.u32 %s1438_s8, 4 }
  0x1a   : > { %s1448_s16 = scalar_lea.vmem %s1640_s0, %s1165_s9  ;;  %v348_v0 = vld [vmem:[%s322_s13] sm:$0xff]  ;;  %v362_v15 = vld [vmem:[%s1643_s3 + $0x68] sm:$0xff]  ;;  %v363_v16 = vld [vmem:[%s1643_s3 + $0x70] sm:$0xff]  ;;  %342 = vst [vmem:[#allocation3] sm:$0x1] %v1344_v38  ;;  %s330_s11 = scalar_lea.vmem %s1642_s2, %s1067_s28 }
  0x1b   : > { %v345_v1 = vld [vmem:[%s1448_s16] sm:$0xff]  ;;  %1104 = vmatprep.subr.mxu0 %v348_v0  ;;  %v364_v17 = vld [vmem:[%s1643_s3 + $0x78] sm:$0xff]  ;;  %v346_v43 = vld [vmem:[%s1448_s16 + $0x8] sm:$0xff]  ;;  %s1068_s8 = sshll.u32 %s1332_s23, 8  ;;  %s906_s13 = sshll.u32 %s307_s12, 4  ;;  %s1593_s13 = int_to_ptr.vmem [resolvable:$true] %s906_s13 }
  0x1c   : > { %445 = vxpose.xlu0.b32.start.end [1/1] (short) %v345_v1, 128  ;;  %1105 = vmatpush3.msra.mxu0 %v348_v0  ;;  %v349_v18 = vld [vmem:[%s1643_s3] sm:$0xff]  ;;  %s1591_s17 = scalar_lea.hbm %s1645_s5, %s1068_s8  ;;  %s1264_s23 = scalar_lea.vmem %s1593_s13, 256 }
  0x1d   : > { %377 = vperm.xlu1 %1227, %v351_v4   ;;  %1162 = vmatprep.mubr.f32.mxu1 %v346_v43  ;;  %p1265_p12 = scmp.ne.s32.totalorder %s1593_s13, %s1264_s23  ;;  %p1271_p1 = scmp.lt.s32.totalorder %s1593_s13, %s1269_s4 }
  0x1f   : > { %p1266_p13 = pnand %p1265_p12, %p1421_p4 }
  0x21   : > { %382 = vperm.xlu1 %1227, %v352_v5   ;;  %p1267_p0 = pneg %p1266_p13 }
  0x25   : > { %387 = vperm.xlu1 %1227, %v353_v6  }
  0x29   : > { %392 = vperm.xlu1 %1227, %v354_v7  }
  0x2d   : > { %397 = vperm.xlu1 %1227, %v355_v8  }
  0x31   : > { %402 = vperm.xlu1 %1227, %v356_v9  }
  0x35   : > { %407 = vperm.xlu1 %1227, %v357_v10  }
  0x39   : > { %412 = vperm.xlu1 %1227, %v358_v11  }
  0x3d   : > { %417 = vperm.xlu1 %1227, %v359_v12  }
  0x41   : > { %422 = vperm.xlu1 %1227, %v360_v13  }
  0x45   : > { %1226 = vset.pattern.permute.xlu0 %v1342_v3  ;;  %427 = vperm.xlu1 %1227, %v361_v14  }
  0x49   : > { %432 = vperm.xlu1 %1227, %v362_v15  }
  0x4d   : > { %437 = vperm.xlu1 %1227, %v363_v16  }
  0x51   : > { %442 = vperm.xlu1 %1227, %v364_v17  }
  0x81   : > { %367 = vperm.xlu0 %1226, %v349_v18  }
  0x93   : > { %v373_v36 = vpop.permute.xlu1 %372 }
  0x98   : > { %v461_v19 = vpop.trf.xlu0  ;;  %v378_v37 = vpop.permute.xlu1 %377 }
  0x99   : > { %1106 = vmatprep.mubr.msk.f32.mxu0 %vm477_vm0, %v461_v19 }
  0x9c   : > { %v462_v20 = vpop.trf.xlu0  ;;  %v383_v39 = vpop.permute.xlu1 %382 }
  0x9d   : > { %1107 = vmatmul.mubr.msk.f32.vlgmr.msra.gmra.mxu0 %vm477_vm0, %v462_v20 }
  0xa0   : > { %v463_v21 = vpop.trf.xlu0  ;;  %v388_v40 = vpop.permute.xlu1 %387 }
  0xa1   : > { %1109 = vmatprep.mubr.msk.f32.mxu0 %vm477_vm0, %v463_v21 }
  0xa4   : > { %v464_v22 = vpop.trf.xlu0  ;;  %v393_v41 = vpop.permute.xlu1 %392 }
  0xa5   : > { %1110 = vmatmul.mubr.msk.f32.gmra.mxu0 %vm477_vm0, %v464_v22 }
  0xa8   : > { %v465_v23 = vpop.trf.xlu0  ;;  %v398_v42 = vpop.permute.xlu1 %397 }
  0xa9   : > { %1112 = vmatprep.mubr.msk.f32.mxu0 %vm477_vm0, %v465_v23 }
  0xac   : > { %v466_v24 = vpop.trf.xlu0  ;;  %v403_v44 = vpop.permute.xlu1 %402 }
  0xad   : > { %1113 = vmatmul.mubr.msk.f32.gmra.mxu0 %vm477_vm0, %v466_v24 }
  0xb0   : > { %v467_v25 = vpop.trf.xlu0  ;;  %v408_v46 = vpop.permute.xlu1 %407 }
  0xb1   : > { %1115 = vmatprep.mubr.msk.f32.mxu0 %vm477_vm0, %v467_v25 }
  0xb4   : > { %v468_v26 = vpop.trf.xlu0  ;;  %v413_v49 = vpop.permute.xlu1 %412 }
  0xb5   : > { %1116 = vmatmul.mubr.msk.f32.gmra.mxu0 %vm477_vm0, %v468_v26 }
  0xb8   : > { %v469_v27 = vpop.trf.xlu0  ;;  %v418_v52 = vpop.permute.xlu1 %417 }
  0xb9   : > { %1118 = vmatprep.mubr.msk.f32.mxu0 %vm477_vm0, %v469_v27 }
  0xbc   : > { %v470_v28 = vpop.trf.xlu0  ;;  %v423_v55 = vpop.permute.xlu1 %422 }
  0xbd   : > { %1119 = vmatmul.mubr.msk.f32.gmra.mxu0 %vm477_vm0, %v470_v28 }
  0xc0   : > { %v471_v29 = vpop.trf.xlu0  ;;  %v428_v58 = vpop.permute.xlu1 %427 }
  0xc1   : > { %1121 = vmatprep.mubr.msk.f32.mxu0 %vm477_vm0, %v471_v29 }
  0xc4   : > { %v472_v30 = vpop.trf.xlu0  ;;  %v433_v61 = vpop.permute.xlu1 %432 }
  0xc5   : > { %1122 = vmatmul.mubr.msk.f32.gmra.mxu0 %vm477_vm0, %v472_v30 }
  0xc8   : > { %v473_v31 = vpop.trf.xlu0  ;;  %v438_v0 = vpop.permute.xlu1 %437 }
  0xc9   : > { %1124 = vmatprep.mubr.msk.f32.mxu0 %vm477_vm0, %v473_v31 }
  0xcc   : > { %v474_v32 = vpop.trf.xlu0  ;;  %v443_v17 = vpop.permute.xlu1 %442 }
  0xcd   : > { %1125 = vmatmul.mubr.msk.f32.gmra.mxu0 %vm477_vm0, %v474_v32 }
  0xd0   : > { %v475_v33 = vpop.trf.xlu0 }
  0xd1   : > { %1127 = vmatprep.mubr.msk.f32.mxu0 %vm477_vm0, %v475_v33 }
  0xd4   : > { %v476_v34 = vpop.trf.xlu0 }
  0xd5   : > { %1128 = vmatmul.mubr.msk.f32.gmra.mxu0 %vm477_vm0, %v476_v34 }
  0xfc   : > { %v368_v1 = vpop.permute.xlu0 %367 }
 0x15d   : > { %v1108_v45 = vpop.f32.mrf.mxu0 }
 0x15e   : > { %v1528_v9 = vadd.f32 %v1108_v45, %v373_v36 }
 0x15f   : > { %v592_v47 = vpop.f32.mrf.mxu0 }
 0x160   : > { %v1522_v6 = vadd.f32 %v592_v47, %v368_v1 }
 0x165   : > { %v1111_v48 = vpop.f32.mrf.mxu0 }
 0x166   : > { %v1530_v10 = vadd.f32 %v1111_v48, %v383_v39  ;;  %v698_v39 = vlaneseq }
 0x167   : > { %v602_v50 = vpop.f32.mrf.mxu0 }
 0x168   : > { %v1532_v11 = vadd.f32 %v602_v50, %v378_v37 }
 0x16d   : > { %v1114_v51 = vpop.f32.mrf.mxu0 }
 0x16e   : > { %v1518_v3 = vadd.f32 %v1114_v51, %v393_v41 }
 0x16f   : > { %v612_v53 = vpop.f32.mrf.mxu0 }
 0x170   : > { %v1516_v2 = vadd.f32 %v612_v53, %v388_v40  ;;  %v673_v18 = vmax.f32 %v1528_v9, %v1518_v3 }
 0x172   : > { %v672_v13 = vmax.f32 %v1522_v6, %v1516_v2 }
 0x175   : > { %v1117_v54 = vpop.f32.mrf.mxu0 }
 0x176   : > { %v1520_v4 = vadd.f32 %v1117_v54, %v403_v44  ;;  %v1543_v44 = vld [vmem:[#allocation2] sm:$0x1] }
 0x177   : > { %v622_v56 = vpop.f32.mrf.mxu0 }
 0x178   : > { %v1524_v7 = vadd.f32 %v622_v56, %v398_v42  ;;  %v675_v19 = vmax.f32 %v1530_v10, %v1520_v4  ;;  %v699_v42 = vshrl.u32 %v698_v39, 7 }
 0x17a   : > { %v674_v21 = vmax.f32 %v1532_v11, %v1524_v7 }
 0x17d   : > { %v1120_v57 = vpop.f32.mrf.mxu0 }
 0x17e   : > { %v638_v12 = vadd.f32 %v1120_v57, %v413_v49 }
 0x17f   : > { %v632_v59 = vpop.f32.mrf.mxu0 }
 0x180   : > { %v1526_v8 = vadd.f32 %v632_v59, %v408_v46  ;;  %v677_v25 = vmax.f32 %v673_v18, %v638_v12  ;;  %v1545_v46 = vsub.s32 0, %v699_v42 }
 0x182   : > { %v676_v22 = vmax.f32 %v672_v13, %v1526_v8 }
 0x185   : > { %v1123_v60 = vpop.f32.mrf.mxu0 }
 0x186   : > { %v648_v14 = vadd.f32 %v1123_v60, %v423_v55 }
 0x187   : > { %v642_v62 = vpop.f32.mrf.mxu0 }
 0x188   : > { %v643_v15 = vadd.f32 %v642_v62, %v418_v52  ;;  %v679_v27 = vmax.f32 %v675_v19, %v648_v14 }
 0x18a   : > { %v678_v28 = vmax.f32 %v674_v21, %v643_v15 }
 0x18d   : > { %v1126_v63 = vpop.f32.mrf.mxu0 }
 0x18e   : > { %v658_v23 = vadd.f32 %v1126_v63, %v433_v61 }
 0x18f   : > { %v652_v5 = vpop.f32.mrf.mxu0 }
 0x190   : > { %v653_v16 = vadd.f32 %v652_v5, %v428_v58  ;;  %v681_v31 = vmax.f32 %v677_v25, %v658_v23 }
 0x192   : > { %v680_v29 = vmax.f32 %v676_v22, %v653_v16 }
 0x194   : > { %v684_v34 = vmax.f32 %v680_v29, %v681_v31 }
 0x195   : > { %v1129_v20 = vpop.f32.mrf.mxu0 }
 0x196   : > { %v668_v24 = vadd.f32 %v1129_v20, %v443_v17 }
 0x197   : > { %v662_v26 = vpop.f32.mrf.mxu0 }
 0x198   : > { %v663_v30 = vadd.f32 %v662_v26, %v438_v0  ;;  %v683_v32 = vmax.f32 %v679_v27, %v668_v24 }
 0x19a   : > { %v682_v33 = vmax.f32 %v678_v28, %v663_v30 }
 0x19c   : > { %v685_v35 = vmax.f32 %v682_v33, %v683_v32 }
 0x19e   : > { %v686_v36 = vmax.f32 %v684_v34, %v685_v35 }
 0x1a0   : > { %v687_v37 = vrot.slane %v686_v36, 4 }
 0x1a2   : > { %v688_v38 = vmax.f32 %v686_v36, %v687_v37 }
 0x1a4   : > { %v689_v40 = vrot.slane %v688_v38, 2 }
 0x1a6   : > { %v690_v41 = vmax.f32 %v688_v38, %v689_v40 }
 0x1a8   : > { %v691_v43 = vrot.slane %v690_v41, 1 }
 0x1aa   : > { %v692_v45 = vmax.f32 %v690_v41, %v691_v43  ;;  %v347_v41 = vld [vmem:[%s1448_s16 + $0x10] sm:$0xff]  ;;  %s871_s16 = sld [smem:[#allocation5]] }
 0x1ac   : > { %v1548_v47 = vmax.f32 %v1543_v44, %v692_v45 }
 0x1ae   : > { %v701_v48 = vrot.slane %v1548_v47, %v1545_v46  ;;  %865 = vst [vmem:[#allocation2] sm:$0x1] %v1548_v47  ;;  %v694_v42 = vsub.f32 %v1543_v44, %v1548_v47 }
 0x1b0   : > { %v717_v49 = vsub.f32 %v663_v30, %v701_v48  ;;  %v718_v50 = vsub.f32 %v668_v24, %v701_v48  ;;  %v716_v51 = vsub.f32 %v658_v23, %v701_v48  ;;  %v715_v54 = vsub.f32 %v653_v16, %v701_v48 }
 0x1b1   : > { %v714_v56 = vsub.f32 %v648_v14, %v701_v48  ;;  %v713_v58 = vsub.f32 %v643_v15, %v701_v48  ;;  %v712_v59 = vsub.f32 %v638_v12, %v701_v48  ;;  %v711_v61 = vsub.f32 %v1526_v8, %v701_v48 }
 0x1b2   : > { %v749_v52 = vmul.f32 1.442695, %v718_v50  ;;  %v747_v53 = vmul.f32 1.442695, %v717_v49  ;;  %v745_v55 = vmul.f32 1.442695, %v716_v51  ;;  %v704_v62 = vsub.f32 %v1528_v9, %v701_v48 }
 0x1b3   : > { %v743_v57 = vmul.f32 1.442695, %v715_v54  ;;  %v741_v60 = vmul.f32 1.442695, %v714_v56  ;;  %v739_v63 = vmul.f32 1.442695, %v713_v58  ;;  %v703_v0 = vsub.f32 %v1522_v6, %v701_v48 }
 0x1b4   : > { %1228 = vpow2.f32 %v749_v52  ;;  %v737_v1 = vmul.f32 1.442695, %v712_v59  ;;  %v710_v5 = vsub.f32 %v1520_v4, %v701_v48  ;;  %v735_v13 = vmul.f32 1.442695, %v711_v61 }
 0x1b5   : > { %1230 = vpow2.f32 %v747_v53  ;;  %v705_v14 = vsub.f32 %v1532_v11, %v701_v48  ;;  %v709_v15 = vsub.f32 %v1524_v7, %v701_v48  ;;  %v721_v12 = vmul.f32 1.442695, %v704_v62 }
 0x1b6   : > { %1232 = vpow2.f32 %v745_v55  ;;  %v706_v16 = vsub.f32 %v1530_v10, %v701_v48  ;;  %v719_v8 = vmul.f32 1.442695, %v703_v0  ;;  %v733_v9 = vmul.f32 1.442695, %v710_v5 }
 0x1b7   : > { %1234 = vpow2.f32 %v743_v57  ;;  %v708_v17 = vsub.f32 %v1518_v3, %v701_v48  ;;  %v707_v6 = vsub.f32 %v1516_v2, %v701_v48  ;;  %v723_v18 = vmul.f32 1.442695, %v705_v14  ;;  %v751_v57 = vld [vmem:[#allocation3] sm:$0x1] }
 0x1b8   : > { %1236 = vpow2.f32 %v741_v60  ;;  %v731_v19 = vmul.f32 1.442695, %v709_v15  ;;  %v725_v7 = vmul.f32 1.442695, %v706_v16  ;;  %v695_v48 = vmul.f32 1.442695, %v694_v42 }
 0x1b9   : > { %1238 = vpow2.f32 %v739_v63  ;;  %v729_v10 = vmul.f32 1.442695, %v708_v17  ;;  %v727_v3 = vmul.f32 1.442695, %v707_v6 }
 0x1ba   : > { %1240 = vpow2.f32 %v737_v1 }
 0x1bb   : > { %1242 = vpow2.f32 %v735_v13  ;;  %v874_v13 = vstv %s871_s16  ;;  %s1270_s16 = scalar_lea.vmem %s1269_s4, 512 }
 0x1bc   : > { %1244 = vpow2.f32 %v721_v12  ;;  %p1272_p2 = scmp.lt.s32.totalorder %s1270_s16, %s1264_s23 }
 0x1bd   : > { %1246 = vpow2.f32 %v719_v8 }
 0x1be   : > { %1248 = vpow2.f32 %v733_v9  ;;  %v886_v9 = vld [vmem:[%s330_s11 + $0x8] sm:$0xff]  ;;  %p1273_p3 = por %p1272_p2, %p1271_p1 }
 0x1bf   : > { %1250 = vpow2.f32 %v723_v18  ;;  %v885_v18 = vld [vmem:[%s330_s11] sm:$0xff] }
 0x1c0   : > { %1252 = vpow2.f32 %v731_v19  ;;  %p1274_p5 = pnand %p1273_p3, %p1267_p0 }
 0x1c1   : > { %v1562_v4 = vpop.eup %1228  ;;  %1254 = vpow2.f32 %v725_v7 }
 0x1c2   : > { %1130 = vmatprep.subr.mxu1 %v1562_v4  ;;  %v1565_v11 = vpop.eup %1230  ;;  %1256 = vpow2.f32 %v729_v10 }
 0x1c3   : > { %1131 = vmatpush3.msra.mxu1 %v1562_v4  ;;  %v1569_v2 = vpop.eup %1232  ;;  %1258 = vpow2.f32 %v727_v3 }
 0x1c4   : > { %1132 = vmatprep.subr.mxu1 %v1565_v11  ;;  %v1235_v20 = vpop.eup %1234  ;;  %1260 = vpow2.f32 %v695_v48 }
 0x1c5   : > { %1133 = vmatpush3.msra.mxu1 %v1565_v11  ;;  %v1237_v21 = vpop.eup %1236 }
 0x1c6   : > { %1134 = vmatprep.subr.mxu1 %v1569_v2  ;;  %v1239_v22 = vpop.eup %1238 }
 0x1c7   : > { %1135 = vmatpush3.msra.mxu1 %v1569_v2  ;;  %v1241_v23 = vpop.eup %1240 }
 0x1c8   : > { %1136 = vmatprep.subr.mxu1 %v1235_v20  ;;  %v1243_v24 = vpop.eup %1242 }
 0x1c9   : > { %1137 = vmatpush3.msra.mxu1 %v1235_v20  ;;  %v1245_v25 = vpop.eup %1244 }
 0x1ca   : > { %1138 = vmatprep.subr.mxu1 %v1237_v21  ;;  %v1247_v26 = vpop.eup %1246 }
 0x1cb   : > { %1139 = vmatpush3.msra.mxu1 %v1237_v21  ;;  %v1249_v27 = vpop.eup %1248  ;;  %v753_v28 = vadd.f32 %v1247_v26, %v1245_v25 }
 0x1cc   : > { %1140 = vmatprep.subr.mxu1 %v1239_v22  ;;  %v1251_v29 = vpop.eup %1250 }
 0x1cd   : > { %1141 = vmatpush3.msra.mxu1 %v1239_v22  ;;  %v1253_v30 = vpop.eup %1252  ;;  %v754_v31 = vadd.f32 %v1251_v29, %v753_v28 }
 0x1ce   : > { %1142 = vmatprep.subr.mxu1 %v1241_v23  ;;  %v1255_v32 = vpop.eup %1254 }
 0x1cf   : > { %1143 = vmatpush3.msra.mxu1 %v1241_v23  ;;  %v1257_v33 = vpop.eup %1256  ;;  %v755_v34 = vadd.f32 %v1255_v32, %v754_v31 }
 0x1d0   : > { %1144 = vmatprep.subr.mxu1 %v1243_v24  ;;  %v1259_v35 = vpop.eup %1258 }
 0x1d1   : > { %1145 = vmatpush3.msra.mxu1 %v1243_v24  ;;  %v756_v36 = vadd.f32 %v1259_v35, %v755_v34  ;;  %v1261_v47 = vpop.eup %1260 }
 0x1d2   : > { %1146 = vmatprep.subr.mxu1 %v1249_v27  ;;  %v752_v59 = vmul.f32 %v1261_v47, %v751_v57  ;;  %v782_v63 = vrot.slane %v1261_v47, %v1545_v46 }
 0x1d3   : > { %1147 = vmatpush3.msra.mxu1 %v1249_v27  ;;  %v757_v37 = vadd.f32 %v1257_v33, %v756_v36 }
 0x1d4   : > { %1148 = vmatprep.subr.mxu1 %v1253_v30  ;;  %v784_v0 = vmul.f32 0.0, %v782_v63 }
 0x1d5   : > { %1149 = vmatpush3.msra.mxu1 %v1253_v30  ;;  %v758_v38 = vadd.f32 %v1253_v30, %v757_v37 }
 0x1d6   : > { %1150 = vmatprep.subr.mxu1 %v1257_v33 }
 0x1d7   : > { %1151 = vmatpush3.msra.mxu1 %v1257_v33  ;;  %v759_v39 = vadd.f32 %v1249_v27, %v758_v38 }
 0x1d8   : > { %1152 = vmatprep.subr.mxu1 %v1259_v35 }
 0x1d9   : > { %1153 = vmatpush3.msra.mxu1 %v1259_v35  ;;  %v760_v40 = vadd.f32 %v1243_v24, %v759_v39 }
 0x1da   : > { %1154 = vmatprep.subr.mxu1 %v1255_v32 }
 0x1db   : > { %1155 = vmatpush3.msra.mxu1 %v1255_v32  ;;  %v761_v43 = vadd.f32 %v1241_v23, %v760_v40 }
 0x1dc   : > { %1156 = vmatprep.subr.mxu1 %v1251_v29 }
 0x1dd   : > { %1157 = vmatpush3.msra.mxu1 %v1251_v29  ;;  %v762_v45 = vadd.f32 %v1239_v22, %v761_v43 }
 0x1de   : > { %1158 = vmatprep.subr.mxu1 %v1245_v25 }
 0x1df   : > { %1159 = vmatpush3.msra.mxu1 %v1245_v25  ;;  %v763_v49 = vadd.f32 %v1237_v21, %v762_v45 }
 0x1e0   : > { %1160 = vmatprep.subr.mxu1 %v1247_v26 }
 0x1e1   : > { %1161 = vmatpush3.msra.mxu1 %v1247_v26  ;;  %v764_v50 = vadd.f32 %v1235_v20, %v763_v49 }
 0x1e2   : > { %1163 = vmatmul.mubr.f32.vlgmr.msra.gmra.mxu1 %v347_v41 }
 0x1e3   : > { %v765_v51 = vadd.f32 %v1569_v2, %v764_v50 }
 0x1e5   : > { %v766_v52 = vadd.f32 %v1565_v11, %v765_v51 }
 0x1e7   : > { %v767_v53 = vadd.f32 %v1562_v4, %v766_v52 }
 0x1e9   : > { %v768_v54 = vrot.slane %v767_v53, 4 }
 0x1eb   : > { %v769_v55 = vadd.f32 %v768_v54, %v767_v53 }
 0x1ed   : > { %v770_v56 = vrot.slane %v769_v55, 2 }
 0x1ef   : > { %v771_v44 = vadd.f32 %v770_v56, %v769_v55 }
 0x1f1   : > { %v772_v58 = vrot.slane %v771_v44, 1 }
 0x1f3   : > { %v773_v60 = vadd.f32 %v772_v58, %v771_v44 }
 0x1f5   : > { %v774_v61 = vadd.f32 %v773_v60, %v752_v59 }
 0x1f7   : > { %775 = vst [vmem:[#allocation3] sm:$0x1] %v774_v61 }
 0x1fe   : > { %v869_v62 = vld [vmem:[#allocation3] sm:$0x1] }
 0x1ff   : > { %1262 = vrcp.f32 %v869_v62 }
 0x20c   : > { %v1263_v1 = vpop.eup %1262 }
 0x20d   : > { %v881_v16 = vrot.slane %v1263_v1, %v1545_v46 }
 0x2a2   : > { %v1164_v5 = vpop.f32.mrf.mxu1 }
 0x2a3   : > { %v862_v14 = vadd.f32 %v1164_v5, %v784_v0 }
 0x2a4   : > { %v852_v15 = vpop.f32.mrf.mxu1 }
 0x2a5   : > { %v876_v12 = vmul.f32 %v874_v13, %v862_v14  ;;  %v861_v8 = vadd.f32 %v852_v15, %v784_v0 }
 0x2a7   : > { %v884_v17 = vmul.f32 %v881_v16, %v876_v12  ;;  %v875_v6 = vmul.f32 %v874_v13, %v861_v8 }
 0x2a9   : > { %v888_v4 = vadd.f32 %v886_v9, %v884_v17  ;;  %v883_v19 = vmul.f32 %v881_v16, %v875_v6 }
 0x2ab   : > { %890 = vst [vmem:[%s307_s12 + $0x8] sm:$0xff] %v888_v4  ;;  %v887_v46 = vadd.f32 %v885_v18, %v883_v19 }
 0x2ad   : > { %889 = vst [vmem:[%s307_s12] sm:$0xff] %v887_v46 }
 0x2ae   : > { %1277 = shalt.err (!%p1274_p5)
}
 0x2af   : > { %s1278_s26 = scalar_lea.hbm %s1591_s17, 256  ;;  %s1282_s9 = scalar_lea.hbm %s1645_s5, 512 }
 0x2b0   : > { %p1279_p6 = scmp.ne.s32.totalorder %s1591_s17, %s1278_s26  ;;  %p1283_p10 = scmp.lt.s32.totalorder %s1591_s17, %s1645_s5 }
 0x2b1   : > { %p1284_p11 = scmp.lt.s32.totalorder %s1282_s9, %s1278_s26 }
 0x2b2   : > { %p1280_p7 = pnand %p1279_p6, %p1421_p4 }
 0x2b3   : > { %p1285_p12 = por %p1284_p11, %p1283_p10 }
 0x2b4   : > { %p1281_p9 = pneg %p1280_p7 }
 0x2b6   : > { %p1286_p13 = pnand %p1285_p12, %p1281_p9 }
 0x2b8   : > { %1289 = shalt.err (!%p1286_p13)
}
 0x2b9   : > { %s1346_s8 = smov 128   ;;  %s1347_s12 = smov 8  }
 0x2ba   : > { %1166 = dma.vmem_to_hbm [thread:$0]  (%p1421_p4), %s1593_s13, 256, %s1591_s17, %s1595_s18, %s1346_s8, %s1346_s8, %s1347_s12  }
 0x2bb PF: > { %p1172_p0 = scmp.ge.s32.totalorder %s1340_s25, 2  ;;  %s921_s14 = sand.u32 1, %s1320_s20  }
 0x2bc   : > { %s922_s15 = scalar_lea.sflag [#allocation7], %s921_s14 }
 0x2bd   : > { %p1169_p1 = pnand %p1172_p0, %p1428_p8 }
 0x2bf   : > { %p1170_p2 = pneg %p1169_p1 }
 0x2c1   : > { %1315 = dma.done.wait (%p1170_p2), %s922_s15, 256  }
 0x2c2   : > { %1317 = vsyncadd (%p1170_p2), %s922_s15, 4294967040  ;;  %s19_s25 = sadd.s32 1, %s1340_s25   ;;  %s1648_s20 = smov %s1324_s21 }
 0x2c3   : > { %p16_p3 = scmp.ge.s32.totalorder %s19_s25, 4   ;;  %s1649_s21 = smov %s1328_s22 }
 0x2c4   : > { %s1650_s22 = smov %s1434_s7  ;;  %s1651_s23 = smov %s1336_s24 }
 0x2c5   : > { %s1652_s24 = smov %s1654_s27  ;;  %18 = sbr.rel (!%p16_p3) target bundleno = 6 (0x6), region = 92 }
 0x2ca   :  { %927 = vsyncpa [#allocation7], 1 }
 0x2cb   :  { %929 = vsyncpa [#allocation7 + $0x1], 1 }

</bundles_post_ra>
